<compile_context>
chip_gen: v5e
topology: v5e:2x2
jax: 0.10.0
libtpu: 0.0.40
codegen_flags: <defaults>
</compile_context>

<pallas_src>
import numpy as np
import jax
import jax.numpy as jnp
from jax.experimental import pallas as pl
from jax.experimental.pallas import tpu as pltpu


def _round_up(x, m):
    return ((x + m - 1) // m) * m


def _ivp_block_kernel(p_ref, d_ref, y0_ref, out_ref, y_carry):
    """One grid step == `Sb` RK4 steps, evaluated as ONE wide MXU matmul.

    p_ref:   (1, D_pad, Sb*D_pad) f32  cumulative propagators [Phi^1..Phi^Sb]
                                       (resident block when the grid is uniform)
    d_ref:   (1, 1,     Sb*D_pad) f32  cumulative affine offsets
    y0_ref:  (B_pad, D_pad)       f32  initial state (only read at block 0)
    out_ref: (Sb, B_pad, D_pad)   f32  this block's trajectory slab
    y_carry: (B_pad, D_pad)       f32  running state across time blocks
    """
    blk = pl.program_id(0)

    @pl.when(blk == 0)
    def _init():
        y_carry[...] = y0_ref[...]

    y = y_carry[...]

    # All Sb steps at once: a single dependency-free
    # (B_pad, D_pad) @ (D_pad, Sb*D_pad) matmul; MXU weight pushes pipeline
    # back-to-back instead of round-tripping through the result FIFO per step.
    wide = jnp.dot(y, p_ref[0], preferred_element_type=jnp.float32) + d_ref[0]

    n_steps = out_ref.shape[0]
    d_pad = out_ref.shape[2]
    for s in range(n_steps):                       # static, tile-aligned slices
        out_ref[s] = wide[:, s * d_pad:(s + 1) * d_pad]

    y_carry[...] = wide[:, (n_steps - 1) * d_pad:]


def _pick_steps_per_block(S, D_pad, B_pad):
    """Largest Sb that fits the per-generation VMEM budget (capped at 32)."""
    try:
        vmem_phys = int(pltpu.get_tpu_info().vmem_capacity_bytes)
    except Exception:
        vmem_phys = 64 << 20                       # v7x floor if query fails
    budget = int(vmem_phys * 0.6)                  # headroom for compiler scratch
    # per-Sb bytes: P (x2 buffers) + d (x2, 8-sublane padded) + out slab (x2)
    # + the wide intermediate held once in VMEM.
    per_step = 4 * (2 * D_pad * D_pad + 2 * 8 * D_pad + 3 * B_pad * D_pad)
    fixed = 4 * (3 * B_pad * D_pad)                # y0 (double-buffered) + carry
    sb = max(1, (budget - fixed) // per_step)
    sb = int(min(sb, 32, max(1, S)))               # amortize ~0.35us/grid-step
    return sb, vmem_phys


def ivp_rk4(y0, t_span, A, b, *, steps_per_block=None):
    """Equivalent of IVP.forward(y0, t_span) with method='rk4'.

    y0:     (B, D) float32
    t_span: (T,)   float32
    A:      (D, D) float32   (dy/dt = y @ A^T + b)
    b:      (D,)   float32
    returns (T, B, D) float32 trajectory with out[0] == y0.
    """
    y0 = jnp.asarray(y0, jnp.float32)
    t_span = jnp.asarray(t_span, jnp.float32)
    A = jnp.asarray(A, jnp.float32)
    b = jnp.asarray(b, jnp.float32)

    B, D = y0.shape
    T = int(t_span.shape[0])
    S = T - 1
    if S <= 0:
        return y0[None]

    B_pad = _round_up(B, 8)                        # sublane multiple
    D_pad = _round_up(D, 128)                      # lane multiple

    if steps_per_block is None:
        Sb, vmem_phys = _pick_steps_per_block(S, D_pad, B_pad)
    else:
        Sb = int(steps_per_block)
        try:
            vmem_phys = int(pltpu.get_tpu_info().vmem_capacity_bytes)
        except Exception:
            vmem_phys = 64 << 20
    S_pad = _round_up(S, Sb)
    nb = S_pad // Sb

    # ---- uniform-grid detection (host side; t_span is concrete here).
    try:
        t_np = np.asarray(jax.device_get(t_span), dtype=np.float64)
        h_np = np.diff(t_np)
        uniform = bool(
            np.all(np.abs(h_np - h_np[0]) <= 1e-6 * max(abs(float(h_np[0])), 1e-12)))
    except Exception:
        uniform = False

    # ---- per-RK4-step affine propagator building blocks.
    M = A.T                                        # row convention: y <- y @ M + b
    I = jnp.eye(D, dtype=jnp.float32)
    M2 = M @ M
    M3 = M2 @ M
    M4 = M3 @ M
    bM = b @ M
    bM2 = bM @ M
    bM3 = bM2 @ M

    def phi_c_of(hv):
        h1 = hv[..., None, None]
        Phi = (I + h1 * M + (h1 ** 2 / 2.0) * M2
               + (h1 ** 3 / 6.0) * M3 + (h1 ** 4 / 24.0) * M4)
        h2 = hv[..., None]
        c = (h2 * b + (h2 ** 2 / 2.0) * bM
             + (h2 ** 3 / 6.0) * bM2 + (h2 ** 4 / 24.0) * bM3)
        return Phi, c

    if uniform:
        # One Phi/c shared by every step: build the within-block cumulative
        # propagators ONCE -> single resident (D_pad, Sb*D_pad) RHS in VMEM.
        h0 = jnp.asarray(float(h_np.mean()), dtype=jnp.float32)
        Phi, c = phi_c_of(h0)                                    # (D,D), (D,)
        Phi_p = jnp.zeros((D_pad, D_pad), jnp.float32).at[:D, :D].set(Phi)
        c_p = jnp.zeros((D_pad,), jnp.float32).at[:D].set(c)
        P_list, d_list = [], []
        P, dvec = Phi_p, c_p
        for s in range(Sb):
            if s:
                P = P @ Phi_p
                dvec = dvec @ Phi_p + c_p
            P_list.append(P)
            d_list.append(dvec)
        P_wide = jnp.concatenate(P_list, axis=1)[None]           # (1, D_pad, Sb*D_pad)
        d_wide = jnp.concatenate(d_list, axis=0)[None, None, :]  # (1, 1, Sb*D_pad)
        p_index = lambda i: (0, 0, 0)                            # resident block
    else:
        # Non-uniform grid: per-block cumulative propagators are streamed.
        h = (t_span[1:] - t_span[:-1]).astype(jnp.float32)       # (S,)
        Phi, c = phi_c_of(h)                                     # (S,D,D), (S,D)
        Phi_p = jnp.zeros((S_pad, D_pad, D_pad), jnp.float32).at[:S, :D, :D].set(Phi)
        if S_pad > S:
            # Identity padding keeps the carried state valid through tail steps.
            Phi_p = Phi_p.at[S:].set(jnp.eye(D_pad, dtype=jnp.float32))
        c_p = jnp.zeros((S_pad, D_pad), jnp.float32).at[:S, :D].set(c)
        Phi_b = Phi_p.reshape(nb, Sb, D_pad, D_pad)
        c_b = c_p.reshape(nb, Sb, D_pad)
        P = Phi_b[:, 0]
        dvec = c_b[:, 0]
        P_list, d_list = [P], [dvec]
        for s in range(1, Sb):
            P = jnp.einsum('bij,bjk->bik', P, Phi_b[:, s])
            dvec = jnp.einsum('bj,bjk->bk', dvec, Phi_b[:, s]) + c_b[:, s]
            P_list.append(P)
            d_list.append(dvec)
        P_wide = jnp.concatenate(P_list, axis=2)                 # (nb, D_pad, Sb*D_pad)
        d_wide = jnp.concatenate(d_list, axis=1)[:, None, :]     # (nb, 1, Sb*D_pad)
        p_index = lambda i: (i, 0, 0)

    y0_p = jnp.zeros((B_pad, D_pad), jnp.float32).at[:B, :D].set(y0)

    # VMEM bound (double-buffered P, d, out slab + y0 + carry) and scoped limit.
    need = 4 * (2 * D_pad * Sb * D_pad
                + 2 * 8 * Sb * D_pad
                + 2 * Sb * B_pad * D_pad
                + 3 * B_pad * D_pad)
    vmem_limit = int(min(vmem_phys * 0.9, max(2 * need, 32 << 20)))

    grid_spec = pltpu.PrefetchScalarGridSpec(
        num_scalar_prefetch=0,
        grid=(nb,),
        in_specs=[
            pl.BlockSpec((1, D_pad, Sb * D_pad), p_index),       # P (resident/streamed)
            pl.BlockSpec((1, 1, Sb * D_pad), p_index),           # d
            pl.BlockSpec((B_pad, D_pad), lambda i: (0, 0)),      # y0 (resident)
        ],
        out_specs=pl.BlockSpec((Sb, B_pad, D_pad), lambda i: (i, 0, 0)),
        scratch_shapes=[pltpu.VMEM((B_pad, D_pad), jnp.float32)],
    )

    steps = pl.pallas_call(
        _ivp_block_kernel,
        out_shape=jax.ShapeDtypeStruct((S_pad, B_pad, D_pad), jnp.float32),
        grid_spec=grid_spec,
        compiler_params=pltpu.CompilerParams(
            dimension_semantics=("arbitrary",),    # sequential recurrence over blocks
            vmem_limit_bytes=vmem_limit,
        ),
    )(P_wide, d_wide, y0_p)

    traj_steps = steps[:S, :B, :D]                               # unpad
    return jnp.concatenate([y0[None], traj_steps], axis=0)       # prepend t0 state


def ivp_rk4_reference(y0, t_span, A, b):
    """Pure-JAX reference (mirrors torchdiffeq fixed-grid rk4)."""
    def f(yv):
        return yv @ A.T + b

    def step(y, tt):
        t0, t1 = tt
        dt = t1 - t0
        k1 = f(y)
        k2 = f(y + 0.5 * dt * k1)
        k3 = f(y + 0.5 * dt * k2)
        k4 = f(y + dt * k3)
        y_new = y + (dt / 6.0) * (k1 + 2.0 * k2 + 2.0 * k3 + k4)
        return y_new, y_new

    _, traj = jax.lax.scan(step, y0, (t_span[:-1], t_span[1:]))
    return jnp.concatenate([y0[None], traj], axis=0)


if __name__ == "__main__":
    B, D, T = 2, 32, 8   # batch of initial conditions, state dim, time points

    key = jax.random.PRNGKey(0)
    k_y0, k_A, k_b = jax.random.split(key, 3)

    # Deterministic "symbolic function" parameters (linear vector field).
    y0 = jax.random.normal(k_y0, (B, D), dtype=jnp.float32)
    A = 0.1 * jax.random.normal(k_A, (D, D), dtype=jnp.float32)
    b = 0.05 * jax.random.normal(k_b, (D,), dtype=jnp.float32)
    t_span = jnp.linspace(0.0, 1.0, T, dtype=jnp.float32)

    traj = jax.block_until_ready(ivp_rk4(y0, t_span, A, b))

    ref = ivp_rk4_reference(y0, t_span, A, b)
    assert traj.shape == (T, B, D)
    assert jnp.allclose(traj, ref, rtol=1e-4, atol=1e-5), (
        float(jnp.max(jnp.abs(traj - ref))))

    # Also exercise the non-uniform-grid (streamed propagator) path.
    t_nu = jnp.cumsum(jnp.array([0.0, 0.1, 0.2, 0.05, 0.3, 0.15, 0.1, 0.1],
                                dtype=jnp.float32))
    traj_nu = jax.block_until_ready(ivp_rk4(y0, t_nu, A, b))
    ref_nu = ivp_rk4_reference(y0, t_nu, A, b)
    assert jnp.allclose(traj_nu, ref_nu, rtol=1e-4, atol=1e-5), (
        float(jnp.max(jnp.abs(traj_nu - ref_nu))))

    print("KERNEL_OK")
</pallas_src>

<mosaic_0001>
module attributes {stable_mosaic.version = 11 : i64} {
  func.func @_ivp_block_kernel(%arg0: i32, %arg1: memref<1x128x896xf32, #tpu.memory_space<vmem>>, %arg2: memref<1x1x896xf32, #tpu.memory_space<vmem>>, %arg3: memref<8x128xf32, #tpu.memory_space<vmem>>, %arg4: memref<7x8x128xf32, #tpu.memory_space<vmem>>, %arg5: memref<8x128xf32, #tpu.memory_space<vmem>>) attributes {dimension_semantics = [#tpu.dimension_semantics<arbitrary>], iteration_bounds = array<i64: 1>, scalar_prefetch = 0 : i64, scratch_operands = 1 : i64, tpu.core_type = #tpu.core_type<tc>, window_params = [{pipeline_mode = #tpu.pipeline_mode<synchronous>, transform_indices = @transform_0, window_bounds = array<i64: 1, 128, 896>}, {pipeline_mode = #tpu.pipeline_mode<synchronous>, transform_indices = @transform_1, window_bounds = array<i64: 1, 1, 896>}, {pipeline_mode = #tpu.pipeline_mode<synchronous>, transform_indices = @transform_2, window_bounds = array<i64: 8, 128>}, {transform_indices = @transform_3, window_bounds = array<i64: 7, 8, 128>}]} {
    %c0_i32 = arith.constant 0 : i32
    %0 = arith.cmpi eq, %arg0, %c0_i32 : i32
    %1 = arith.extui %0 : i1 to i32
    %c0_i32_0 = arith.constant 0 : i32
    %2 = arith.cmpi ne, %1, %c0_i32_0 : i32
    scf.if %2 {
      %c0_25 = arith.constant 0 : index
      %c0_26 = arith.constant 0 : index
      %41 = vector.load %arg3[%c0_25, %c0_26] : memref<8x128xf32, #tpu.memory_space<vmem>>, vector<8x128xf32>
      %c0_27 = arith.constant 0 : index
      %c0_28 = arith.constant 0 : index
      %42 = vector.load %arg5[%c0_27, %c0_28] : memref<8x128xf32, #tpu.memory_space<vmem>>, vector<8x128xf32>
      tpu.vector_store %arg5[%c0_27, %c0_28], %41 {strides = array<i32>} : memref<8x128xf32, #tpu.memory_space<vmem>>, vector<8x128xf32>,
    } else {
    }
    %c0 = arith.constant 0 : index
    %c0_1 = arith.constant 0 : index
    %3 = vector.load %arg5[%c0, %c0_1] : memref<8x128xf32, #tpu.memory_space<vmem>>, vector<8x128xf32>
    %c0_2 = arith.constant 0 : index
    %c0_3 = arith.constant 0 : index
    %c0_4 = arith.constant 0 : index
    %4 = vector.load %arg1[%c0_2, %c0_3, %c0_4] : memref<1x128x896xf32, #tpu.memory_space<vmem>>, vector<1x128x896xf32>
    %5 = vector.shape_cast %4 : vector<1x128x896xf32> to vector<128x896xf32>
    %cst = arith.constant dense<0.000000e+00> : vector<8x896xf32>
    %6 = tpu.matmul %3, %5, %cst {dimension_numbers = #tpu.dot_dimension_numbers<[1], [0], [0], [1], [0, 0, 1, 1], [], []>} : vector<8x128xf32>, vector<128x896xf32>, vector<8x896xf32> -> vector<8x896xf32>
    %c0_5 = arith.constant 0 : index
    %c0_6 = arith.constant 0 : index
    %c0_7 = arith.constant 0 : index
    %7 = vector.load %arg2[%c0_5, %c0_6, %c0_7] : memref<1x1x896xf32, #tpu.memory_space<vmem>>, vector<1x1x896xf32>
    %8 = vector.shape_cast %7 : vector<1x1x896xf32> to vector<1x896xf32>
    %9 = vector.broadcast %8 : vector<1x896xf32> to vector<8x896xf32>
    %10 = arith.addf %6, %9 : vector<8x896xf32>
    %11 = vector.extract_strided_slice %10 {offsets = [0, 0], sizes = [8, 128], strides = [1, 1]} : vector<8x896xf32> to vector<8x128xf32>
    %c0_8 = arith.constant 0 : index
    %c0_9 = arith.constant 0 : index
    %c0_10 = arith.constant 0 : index
    %12 = vector.load %arg4[%c0_8, %c0_9, %c0_10] : memref<7x8x128xf32, #tpu.memory_space<vmem>>, vector<1x8x128xf32>
    %13 = vector.shape_cast %12 : vector<1x8x128xf32> to vector<8x128xf32>
    %14 = vector.shape_cast %11 : vector<8x128xf32> to vector<1x8x128xf32>
    tpu.vector_store %arg4[%c0_8, %c0_9, %c0_10], %14 {strides = array<i32>} : memref<7x8x128xf32, #tpu.memory_space<vmem>>, vector<1x8x128xf32>,
    %15 = vector.extract_strided_slice %10 {offsets = [0, 128], sizes = [8, 128], strides = [1, 1]} : vector<8x896xf32> to vector<8x128xf32>
    %c1 = arith.constant 1 : index
    %c0_11 = arith.constant 0 : index
    %c0_12 = arith.constant 0 : index
    %16 = vector.load %arg4[%c1, %c0_11, %c0_12] : memref<7x8x128xf32, #tpu.memory_space<vmem>>, vector<1x8x128xf32>
    %17 = vector.shape_cast %16 : vector<1x8x128xf32> to vector<8x128xf32>
    %18 = vector.shape_cast %15 : vector<8x128xf32> to vector<1x8x128xf32>
    tpu.vector_store %arg4[%c1, %c0_11, %c0_12], %18 {strides = array<i32>} : memref<7x8x128xf32, #tpu.memory_space<vmem>>, vector<1x8x128xf32>,
    %19 = vector.extract_strided_slice %10 {offsets = [0, 256], sizes = [8, 128], strides = [1, 1]} : vector<8x896xf32> to vector<8x128xf32>
    %c2 = arith.constant 2 : index
    %c0_13 = arith.constant 0 : index
    %c0_14 = arith.constant 0 : index
    %20 = vector.load %arg4[%c2, %c0_13, %c0_14] : memref<7x8x128xf32, #tpu.memory_space<vmem>>, vector<1x8x128xf32>
    %21 = vector.shape_cast %20 : vector<1x8x128xf32> to vector<8x128xf32>
    %22 = vector.shape_cast %19 : vector<8x128xf32> to vector<1x8x128xf32>
    tpu.vector_store %arg4[%c2, %c0_13, %c0_14], %22 {strides = array<i32>} : memref<7x8x128xf32, #tpu.memory_space<vmem>>, vector<1x8x128xf32>,
    %23 = vector.extract_strided_slice %10 {offsets = [0, 384], sizes = [8, 128], strides = [1, 1]} : vector<8x896xf32> to vector<8x128xf32>
    %c3 = arith.constant 3 : index
    %c0_15 = arith.constant 0 : index
    %c0_16 = arith.constant 0 : index
    %24 = vector.load %arg4[%c3, %c0_15, %c0_16] : memref<7x8x128xf32, #tpu.memory_space<vmem>>, vector<1x8x128xf32>
    %25 = vector.shape_cast %24 : vector<1x8x128xf32> to vector<8x128xf32>
    %26 = vector.shape_cast %23 : vector<8x128xf32> to vector<1x8x128xf32>
    tpu.vector_store %arg4[%c3, %c0_15, %c0_16], %26 {strides = array<i32>} : memref<7x8x128xf32, #tpu.memory_space<vmem>>, vector<1x8x128xf32>,
    %27 = vector.extract_strided_slice %10 {offsets = [0, 512], sizes = [8, 128], strides = [1, 1]} : vector<8x896xf32> to vector<8x128xf32>
    %c4 = arith.constant 4 : index
    %c0_17 = arith.constant 0 : index
    %c0_18 = arith.constant 0 : index
    %28 = vector.load %arg4[%c4, %c0_17, %c0_18] : memref<7x8x128xf32, #tpu.memory_space<vmem>>, vector<1x8x128xf32>
    %29 = vector.shape_cast %28 : vector<1x8x128xf32> to vector<8x128xf32>
    %30 = vector.shape_cast %27 : vector<8x128xf32> to vector<1x8x128xf32>
    tpu.vector_store %arg4[%c4, %c0_17, %c0_18], %30 {strides = array<i32>} : memref<7x8x128xf32, #tpu.memory_space<vmem>>, vector<1x8x128xf32>,
    %31 = vector.extract_strided_slice %10 {offsets = [0, 640], sizes = [8, 128], strides = [1, 1]} : vector<8x896xf32> to vector<8x128xf32>
    %c5 = arith.constant 5 : index
    %c0_19 = arith.constant 0 : index
    %c0_20 = arith.constant 0 : index
    %32 = vector.load %arg4[%c5, %c0_19, %c0_20] : memref<7x8x128xf32, #tpu.memory_space<vmem>>, vector<1x8x128xf32>
    %33 = vector.shape_cast %32 : vector<1x8x128xf32> to vector<8x128xf32>
    %34 = vector.shape_cast %31 : vector<8x128xf32> to vector<1x8x128xf32>
    tpu.vector_store %arg4[%c5, %c0_19, %c0_20], %34 {strides = array<i32>} : memref<7x8x128xf32, #tpu.memory_space<vmem>>, vector<1x8x128xf32>,
    %35 = vector.extract_strided_slice %10 {offsets = [0, 768], sizes = [8, 128], strides = [1, 1]} : vector<8x896xf32> to vector<8x128xf32>
    %c6 = arith.constant 6 : index
    %c0_21 = arith.constant 0 : index
    %c0_22 = arith.constant 0 : index
    %36 = vector.load %arg4[%c6, %c0_21, %c0_22] : memref<7x8x128xf32, #tpu.memory_space<vmem>>, vector<1x8x128xf32>
    %37 = vector.shape_cast %36 : vector<1x8x128xf32> to vector<8x128xf32>
    %38 = vector.shape_cast %35 : vector<8x128xf32> to vector<1x8x128xf32>
    tpu.vector_store %arg4[%c6, %c0_21, %c0_22], %38 {strides = array<i32>} : memref<7x8x128xf32, #tpu.memory_space<vmem>>, vector<1x8x128xf32>,
    %39 = vector.extract_strided_slice %10 {offsets = [0, 768], sizes = [8, 128], strides = [1, 1]} : vector<8x896xf32> to vector<8x128xf32>
    %c0_23 = arith.constant 0 : index
    %c0_24 = arith.constant 0 : index
    %40 = vector.load %arg5[%c0_23, %c0_24] : memref<8x128xf32, #tpu.memory_space<vmem>>, vector<8x128xf32>
    tpu.vector_store %arg5[%c0_23, %c0_24], %39 {strides = array<i32>} : memref<8x128xf32, #tpu.memory_space<vmem>>, vector<8x128xf32>,
    return
  }
  func.func @transform_0(%arg0: i32) -> (i32, i32, i32) {
    %c0_i32 = arith.constant 0 : i32
    %c0_i32_0 = arith.constant 0 : i32
    %c0_i32_1 = arith.constant 0 : i32
    %c0_i32_2 = arith.constant 0 : i32
    return %c0_i32, %c0_i32_0, %c0_i32_1 : i32, i32, i32
  }
  func.func @transform_1(%arg0: i32) -> (i32, i32, i32) {
    %c0_i32 = arith.constant 0 : i32
    %c0_i32_0 = arith.constant 0 : i32
    %c0_i32_1 = arith.constant 0 : i32
    %c0_i32_2 = arith.constant 0 : i32
    return %c0_i32, %c0_i32_0, %c0_i32_1 : i32, i32, i32
  }
  func.func @transform_2(%arg0: i32) -> (i32, i32) {
    %c0_i32 = arith.constant 0 : i32
    %c0_i32_0 = arith.constant 0 : i32
    %c0_i32_1 = arith.constant 0 : i32
    return %c0_i32, %c0_i32_0 : i32, i32
  }
  func.func @transform_3(%arg0: i32) -> (i32, i32, i32) {
    %c0_i32 = arith.constant 0 : i32
    %c0_i32_0 = arith.constant 0 : i32
    %c0_i32_1 = arith.constant 0 : i32
    return %arg0, %c0_i32, %c0_i32_0 : i32, i32, i32
  }
}

</mosaic_0001>

<bundles_post_ra>
// kernel: tpu_custom_call.1
= control target key start
LH: loop header
LB: loop body
LE: loop exit
PB: predicated region body
PF: predicated region fallthrough
CT: control target
= control target key end

     0   :  { %8 = vsyncpa [#allocation4], 0  ;;  %s526_s0 = inlined_call_operand.hbm [shape: f32[1,128,896], index: 0, kind: input, shape index: {}]   ;;  %s527_s1 = inlined_call_operand.hbm [shape: f32[1,1,896], index: 1, kind: input, shape index: {}]   ;;  %s528_s2 = inlined_call_operand.hbm [shape: f32[8,128], index: 2, kind: input, shape index: {}]   ;;  %s529_s3 = inlined_call_operand.hbm [shape: f32[7,8,128], index: 3, kind: output, shape index: {}]  }
   0x1   :  { %9 = vsyncpa [#allocation7], 0  ;;  %s29_s14 = sshll.u32 %s527_s1, 4  ;;  %s30_s14 = int_to_ptr.hbm [resolvable:$true] %s29_s14 }
   0x2   :  { %10 = vsyncpa [#allocation5], 0  ;;  %s477_s15 = smov [#allocation6]   ;;  %s15_s19 = sshll.u32 %s526_s0, 4  ;;  %s16_s19 = int_to_ptr.hbm [resolvable:$true] %s15_s19 }
   0x3   :  { %s31_s16 = sshll.u32 %s477_s15, 4  ;;  %s478_s20 = smov [#allocation3]   ;;  %s32_s16 = int_to_ptr.vmem [resolvable:$true] %s31_s16 }
   0x4   :  { %34 = dma.hbm_to_vmem [thread:$0]  %s30_s14, 112, %s32_s16, [#allocation7]  }
   0x5   :  { %s17_s21 = sshll.u32 %s478_s20, 4  ;;  %s479_s22 = smov 896   ;;  %s18_s21 = int_to_ptr.vmem [resolvable:$true] %s17_s21 }
   0x6   :  { %s480_s23 = smov 56   ;;  %s40_s1 = sshll.u32 %s528_s2, 4  ;;  %s41_s1 = int_to_ptr.hbm [resolvable:$true] %s40_s1 }
   0x7   :  { %23 = dma.hbm_to_vmem [thread:$0]  %s16_s19, 14336, %s18_s21, [#allocation4], %s479_s22, %s479_s22, %s480_s23  }
   0x8   :  { %s481_s26 = smov [#allocation8]  }
   0x9   :  { %s42_s27 = sshll.u32 %s481_s26, 4  ;;  %s43_s27 = int_to_ptr.vmem [resolvable:$true] %s42_s27 }
   0xa   :  { %45 = dma.hbm_to_vmem [thread:$0]  %s41_s1, 128, %s43_s27, [#allocation7]  }
   0xb   :  { %471 = dma.done.wait [#allocation4], 14336  }
   0xc   :  { %472 = vsyncadd [#allocation4], 4294952960 }
   0xd   :  { %473 = dma.done.wait [#allocation7], 240  }
   0xe   :  { %474 = vsyncadd [#allocation7], 4294967056  ;;  %v172_v0 = vld [vmem:[#allocation3 + $0x358] sm:$0xff]  ;;  %v165_v1 = vld [vmem:[#allocation3 + $0x320] sm:$0xff]  ;;  %s482_s0 = smov [#allocation9]   ;;  %s353_s30 = sshll.u32 %s529_s3, 4  ;;  %s354_s30 = int_to_ptr.hbm [resolvable:$true] %s353_s30 }
   0xf   :  { %233 = vmatpush.msra.mxu2 %v172_v0  ;;  %v170_v2 = vld [vmem:[#allocation3 + $0x348] sm:$0xff]  ;;  %v171_v3 = vld [vmem:[#allocation3 + $0x350] sm:$0xff]  ;;  %v164_v6 = vld [vmem:[#allocation3 + $0x318] sm:$0xff]  ;;  %s351_s2 = sshll.u32 %s482_s0, 4  ;;  %s483_s4 = smov 128   ;;  %s352_s2 = int_to_ptr.vmem [resolvable:$true] %s351_s2 }
  0x10   :  { %v158_v4 = vld [vmem:[#allocation3 + $0x2e8] sm:$0xff]  ;;  %193 = vmatpush.msra.mxu0 %v170_v2  ;;  %213 = vmatpush.msra.mxu1 %v171_v3  ;;  %v163_v5 = vld [vmem:[#allocation3 + $0x310] sm:$0xff]  ;;  %v156_v7 = vld [vmem:[#allocation3 + $0x2d8] sm:$0xff]  ;;  %s484_s5 = smov 8  }
  0x11   :  { %234 = vmatpush.msra.mxu2 %v165_v1  ;;  %v157_v8 = vld [vmem:[#allocation3 + $0x2e0] sm:$0xff]  ;;  %v151_v9 = vld [vmem:[#allocation3 + $0x2b0] sm:$0xff]  ;;  %v150_v11 = vld [vmem:[#allocation3 + $0x2a8] sm:$0xff] }
  0x12   :  { %194 = vmatpush.msra.mxu0 %v163_v5  ;;  %214 = vmatpush.msra.mxu1 %v164_v6  ;;  %v149_v10 = vld [vmem:[#allocation3 + $0x2a0] sm:$0xff]  ;;  %v144_v12 = vld [vmem:[#allocation3 + $0x278] sm:$0xff]  ;;  %v142_v13 = vld [vmem:[#allocation3 + $0x268] sm:$0xff] }
  0x13   :  { %235 = vmatpush.msra.mxu2 %v158_v4  ;;  %v143_v14 = vld [vmem:[#allocation3 + $0x270] sm:$0xff]  ;;  %v137_v15 = vld [vmem:[#allocation3 + $0x240] sm:$0xff]  ;;  %v136_v17 = vld [vmem:[#allocation3 + $0x238] sm:$0xff] }
  0x14   :  { %195 = vmatpush.msra.mxu0 %v156_v7  ;;  %215 = vmatpush.msra.mxu1 %v157_v8  ;;  %v135_v16 = vld [vmem:[#allocation3 + $0x230] sm:$0xff]  ;;  %v130_v18 = vld [vmem:[#allocation3 + $0x208] sm:$0xff]  ;;  %v128_v19 = vld [vmem:[#allocation3 + $0x1f8] sm:$0xff] }
  0x15   :  { %236 = vmatpush.msra.mxu2 %v151_v9  ;;  %v129_v20 = vld [vmem:[#allocation3 + $0x200] sm:$0xff]  ;;  %v123_v21 = vld [vmem:[#allocation3 + $0x1d0] sm:$0xff]  ;;  %v122_v23 = vld [vmem:[#allocation3 + $0x1c8] sm:$0xff] }
  0x16   :  { %196 = vmatpush.msra.mxu0 %v149_v10  ;;  %216 = vmatpush.msra.mxu1 %v150_v11  ;;  %v121_v22 = vld [vmem:[#allocation3 + $0x1c0] sm:$0xff]  ;;  %v116_v24 = vld [vmem:[#allocation3 + $0x198] sm:$0xff]  ;;  %v114_v26 = vld [vmem:[#allocation3 + $0x188] sm:$0xff] }
  0x17   :  { %237 = vmatpush.msra.mxu2 %v144_v12  ;;  %v173_v25 = vld [vmem:[#allocation3 + $0x360] sm:$0xff]  ;;  %v115_v27 = vld [vmem:[#allocation3 + $0x190] sm:$0xff]  ;;  %v166_v28 = vld [vmem:[#allocation3 + $0x328] sm:$0xff] }
  0x18   :  { %197 = vmatpush.msra.mxu0 %v142_v13  ;;  %217 = vmatpush.msra.mxu1 %v143_v14  ;;  %v109_v29 = vld [vmem:[#allocation3 + $0x160] sm:$0xff]  ;;  %v159_v30 = vld [vmem:[#allocation3 + $0x2f0] sm:$0xff]  ;;  %v108_v32 = vld [vmem:[#allocation3 + $0x158] sm:$0xff] }
  0x19   :  { %238 = vmatpush.msra.mxu2 %v137_v15  ;;  %253 = vmatpush.msra.mxu3 %v173_v25  ;;  %v107_v31 = vld [vmem:[#allocation3 + $0x150] sm:$0xff]  ;;  %v102_v33 = vld [vmem:[#allocation3 + $0x128] sm:$0xff]  ;;  %v152_v34 = vld [vmem:[#allocation3 + $0x2b8] sm:$0xff] }
  0x1a   :  { %198 = vmatpush.msra.mxu0 %v135_v16  ;;  %218 = vmatpush.msra.mxu1 %v136_v17  ;;  %v100_v35 = vld [vmem:[#allocation3 + $0x118] sm:$0xff]  ;;  %v101_v36 = vld [vmem:[#allocation3 + $0x120] sm:$0xff]  ;;  %v95_v37 = vld [vmem:[#allocation3 + $0xf0] sm:$0xff] }
  0x1b   :  { %239 = vmatpush.msra.mxu2 %v130_v18  ;;  %254 = vmatpush.msra.mxu3 %v166_v28  ;;  %v145_v38 = vld [vmem:[#allocation3 + $0x280] sm:$0xff]  ;;  %v94_v40 = vld [vmem:[#allocation3 + $0xe8] sm:$0xff]  ;;  %v88_v41 = vld [vmem:[#allocation3 + $0xb8] sm:$0xff] }
  0x1c   :  { %199 = vmatpush.msra.mxu0 %v128_v19  ;;  %219 = vmatpush.msra.mxu1 %v129_v20  ;;  %v93_v39 = vld [vmem:[#allocation3 + $0xe0] sm:$0xff]  ;;  %v138_v42 = vld [vmem:[#allocation3 + $0x248] sm:$0xff]  ;;  %v87_v44 = vld [vmem:[#allocation3 + $0xb0] sm:$0xff] }
  0x1d   :  { %240 = vmatpush.msra.mxu2 %v123_v21  ;;  %255 = vmatpush.msra.mxu3 %v159_v30  ;;  %v86_v43 = vld [vmem:[#allocation3 + $0xa8] sm:$0xff]  ;;  %v81_v45 = vld [vmem:[#allocation3 + $0x80] sm:$0xff]  ;;  %v131_v46 = vld [vmem:[#allocation3 + $0x210] sm:$0xff] }
  0x1e   :  { %200 = vmatpush.msra.mxu0 %v121_v22  ;;  %220 = vmatpush.msra.mxu1 %v122_v23  ;;  %v79_v47 = vld [vmem:[#allocation3 + $0x70] sm:$0xff]  ;;  %v80_v48 = vld [vmem:[#allocation3 + $0x78] sm:$0xff]  ;;  %v74_v49 = vld [vmem:[#allocation3 + $0x48] sm:$0xff] }
  0x1f   :  { %241 = vmatpush.msra.mxu2 %v116_v24  ;;  %256 = vmatpush.msra.mxu3 %v152_v34  ;;  %v124_v50 = vld [vmem:[#allocation3 + $0x1d8] sm:$0xff]  ;;  %v73_v52 = vld [vmem:[#allocation3 + $0x40] sm:$0xff]  ;;  %v67_v53 = vld [vmem:[#allocation3 + $0x10] sm:$0xff] }
  0x20   :  { %201 = vmatpush.msra.mxu0 %v114_v26  ;;  %221 = vmatpush.msra.mxu1 %v115_v27  ;;  %v72_v51 = vld [vmem:[#allocation3 + $0x38] sm:$0xff]  ;;  %v117_v54 = vld [vmem:[#allocation3 + $0x1a0] sm:$0xff]  ;;  %v66_v57 = vld [vmem:[#allocation3 + $0x8] sm:$0xff] }
  0x21   :  { %242 = vmatpush.msra.mxu2 %v109_v29  ;;  %257 = vmatpush.msra.mxu3 %v145_v38  ;;  %v176_v55 = vld [vmem:[#allocation3 + $0x378] sm:$0xff]  ;;  %v65_v56 = vld [vmem:[#allocation3] sm:$0xff]  ;;  %v174_v58 = vld [vmem:[#allocation3 + $0x368] sm:$0xff] }
  0x22   :  { %202 = vmatpush.msra.mxu0 %v107_v31  ;;  %222 = vmatpush.msra.mxu1 %v108_v32  ;;  %v169_v59 = vld [vmem:[#allocation3 + $0x340] sm:$0xff]  ;;  %v175_v60 = vld [vmem:[#allocation3 + $0x370] sm:$0xff]  ;;  %v110_v62 = vld [vmem:[#allocation3 + $0x168] sm:$0xff] }
  0x23   :  { %243 = vmatpush.msra.mxu2 %v102_v33  ;;  %258 = vmatpush.msra.mxu3 %v138_v42  ;;  %v167_v61 = vld [vmem:[#allocation3 + $0x330] sm:$0xff]  ;;  %v162_v63 = vld [vmem:[#allocation3 + $0x308] sm:$0xff]  ;;  %v168_v0 = vld [vmem:[#allocation3 + $0x338] sm:$0xff] }
  0x24   :  { %203 = vmatpush.msra.mxu0 %v100_v35  ;;  %223 = vmatpush.msra.mxu1 %v101_v36  ;;  %v160_v1 = vld [vmem:[#allocation3 + $0x2f8] sm:$0xff]  ;;  %v103_v2 = vld [vmem:[#allocation3 + $0x130] sm:$0xff]  ;;  %v161_v4 = vld [vmem:[#allocation3 + $0x300] sm:$0xff] }
  0x25   :  { %244 = vmatpush.msra.mxu2 %v95_v37  ;;  %259 = vmatpush.msra.mxu3 %v131_v46  ;;  %v155_v3 = vld [vmem:[#allocation3 + $0x2d0] sm:$0xff]  ;;  %v153_v5 = vld [vmem:[#allocation3 + $0x2c0] sm:$0xff]  ;;  %v96_v6 = vld [vmem:[#allocation3 + $0xf8] sm:$0xff] }
  0x26   :  { %204 = vmatpush.msra.mxu0 %v93_v39  ;;  %224 = vmatpush.msra.mxu1 %v94_v40  ;;  %v148_v7 = vld [vmem:[#allocation3 + $0x298] sm:$0xff]  ;;  %v154_v8 = vld [vmem:[#allocation3 + $0x2c8] sm:$0xff]  ;;  %v141_v11 = vld [vmem:[#allocation3 + $0x260] sm:$0xff] }
  0x27   :  { %245 = vmatpush.msra.mxu2 %v88_v41  ;;  %260 = vmatpush.msra.mxu3 %v124_v50  ;;  %v146_v9 = vld [vmem:[#allocation3 + $0x288] sm:$0xff]  ;;  %v147_v12 = vld [vmem:[#allocation3 + $0x290] sm:$0xff]  ;;  %v89_v14 = vld [vmem:[#allocation3 + $0xc0] sm:$0xff] }
  0x28   :  { %205 = vmatpush.msra.mxu0 %v86_v43  ;;  %225 = vmatpush.msra.mxu1 %v87_v44  ;;  %v514_v10 = vld [vmem:[#allocation8] sm:$0xff]  ;;  %v139_v13 = vld [vmem:[#allocation3 + $0x250] sm:$0xff]  ;;  %v140_v16 = vld [vmem:[#allocation3 + $0x258] sm:$0xff] }
  0x29   :  { %246 = vmatpush.msra.mxu2 %v81_v45  ;;  %261 = vmatpush.msra.mxu3 %v117_v54  ;;  %v134_v15 = vld [vmem:[#allocation3 + $0x228] sm:$0xff]  ;;  %v132_v17 = vld [vmem:[#allocation3 + $0x218] sm:$0xff]  ;;  %v127_v19 = vld [vmem:[#allocation3 + $0x1f0] sm:$0xff] }
  0x2a   :  { %206 = vmatpush.msra.mxu0 %v79_v47  ;;  %226 = vmatpush.msra.mxu1 %v80_v48  ;;  %v82_v18 = vld [vmem:[#allocation3 + $0x88] sm:$0xff]  ;;  %v133_v20 = vld [vmem:[#allocation3 + $0x220] sm:$0xff]  ;;  %v75_v22 = vld [vmem:[#allocation3 + $0x50] sm:$0xff] }
  0x2b   :  { %247 = vmatpush.msra.mxu2 %v74_v49  ;;  %262 = vmatpush.msra.mxu3 %v110_v62  ;;  %v125_v21 = vld [vmem:[#allocation3 + $0x1e0] sm:$0xff]  ;;  %v120_v23 = vld [vmem:[#allocation3 + $0x1b8] sm:$0xff]  ;;  %v126_v24 = vld [vmem:[#allocation3 + $0x1e8] sm:$0xff] }
  0x2c   :  { %207 = vmatpush.msra.mxu0 %v72_v51  ;;  %227 = vmatpush.msra.mxu1 %v73_v52  ;;  %v118_v25 = vld [vmem:[#allocation3 + $0x1a8] sm:$0xff]  ;;  %v113_v26 = vld [vmem:[#allocation3 + $0x180] sm:$0xff]  ;;  %v119_v27 = vld [vmem:[#allocation3 + $0x1b0] sm:$0xff] }
  0x2d   :  { %248 = vmatpush.msra.mxu2 %v67_v53  ;;  %263 = vmatpush.msra.mxu3 %v103_v2  ;;  %v111_v28 = vld [vmem:[#allocation3 + $0x170] sm:$0xff]  ;;  %v68_v29 = vld [vmem:[#allocation3 + $0x18] sm:$0xff]  ;;  %v106_v30 = vld [vmem:[#allocation3 + $0x148] sm:$0xff] }
  0x2e   :  { %208 = vmatpush.msra.mxu0 %v65_v56  ;;  %228 = vmatpush.msra.mxu1 %v66_v57  ;;  %v112_v31 = vld [vmem:[#allocation3 + $0x178] sm:$0xff]  ;;  %v99_v33 = vld [vmem:[#allocation3 + $0x110] sm:$0xff]  ;;  %v105_v34 = vld [vmem:[#allocation3 + $0x140] sm:$0xff] }
  0x2f   :  { %313 = vmatpush.msrb.mxu2 %v176_v55  ;;  %264 = vmatpush.msra.mxu3 %v96_v6  ;;  %v104_v32 = vld [vmem:[#allocation3 + $0x138] sm:$0xff]  ;;  %v97_v35 = vld [vmem:[#allocation3 + $0x100] sm:$0xff]  ;;  %v98_v37 = vld [vmem:[#allocation3 + $0x108] sm:$0xff] }
  0x30   :  { %273 = vmatpush.msrb.mxu0 %v174_v58  ;;  %293 = vmatpush.msrb.mxu1 %v175_v60  ;;  %v92_v36 = vld [vmem:[#allocation3 + $0xd8] sm:$0xff]  ;;  %v85_v38 = vld [vmem:[#allocation3 + $0xa0] sm:$0xff]  ;;  %v90_v39 = vld [vmem:[#allocation3 + $0xc8] sm:$0xff] }
  0x31   :  { %314 = vmatpush.msrb.mxu2 %v169_v59  ;;  %265 = vmatpush.msra.mxu3 %v89_v14  ;;  %v91_v40 = vld [vmem:[#allocation3 + $0xd0] sm:$0xff]  ;;  %v78_v41 = vld [vmem:[#allocation3 + $0x68] sm:$0xff]  ;;  %v84_v43 = vld [vmem:[#allocation3 + $0x98] sm:$0xff] }
  0x32   :  { %274 = vmatpush.msrb.mxu0 %v167_v61  ;;  %294 = vmatpush.msrb.mxu1 %v168_v0  ;;  %v83_v42 = vld [vmem:[#allocation3 + $0x90] sm:$0xff]  ;;  %v76_v45 = vld [vmem:[#allocation3 + $0x58] sm:$0xff]  ;;  %v77_v46 = vld [vmem:[#allocation3 + $0x60] sm:$0xff] }
  0x33   :  { %315 = vmatpush.msrb.mxu2 %v162_v63  ;;  %266 = vmatpush.msra.mxu3 %v82_v18  ;;  %v71_v44 = vld [vmem:[#allocation3 + $0x30] sm:$0xff]  ;;  %v69_v47 = vld [vmem:[#allocation3 + $0x20] sm:$0xff]  ;;  %v70_v48 = vld [vmem:[#allocation3 + $0x28] sm:$0xff] }
  0x34   :  { %275 = vmatpush.msrb.mxu0 %v160_v1  ;;  %295 = vmatpush.msrb.mxu1 %v161_v4  ;;  %v177_v49 = vld [vmem:[#allocation6] sm:$0xff] }
  0x35   :  { %316 = vmatpush.msrb.mxu2 %v155_v3  ;;  %267 = vmatpush.msra.mxu3 %v75_v22  ;;  %v181_v50 = vperm.slane %v177_v49, 2  ;;  %v180_v51 = vperm.slane %v177_v49, 1  ;;  %v179_v56 = vperm.slane %v177_v49, 0  ;;  %v182_v57 = vperm.slane %v177_v49, 3 }
  0x36   :  { %276 = vmatpush.msrb.mxu0 %v153_v5  ;;  %296 = vmatpush.msrb.mxu1 %v154_v8  ;;  %v183_v62 = vperm.slane %v177_v49, 4  ;;  %v184_v63 = vperm.slane %v177_v49, 5  ;;  %v185_v3 = vperm.slane %v177_v49, 6 }
  0x37   :  { %317 = vmatpush.msrb.mxu2 %v148_v7  ;;  %229 = vmatmul.f32.vlgmr.msra.gmra.mxu1 %v514_v10 }
  0x38   :  { %277 = vmatpush.msrb.mxu0 %v146_v9  ;;  %249 = vmatmul.f32.vlgmr.msra.gmra.mxu2 %v514_v10 }
  0x39   :  { %318 = vmatpush.msrb.mxu2 %v141_v11  ;;  %297 = vmatpush.msrb.mxu1 %v147_v12 }
  0x3a   :  { %278 = vmatpush.msrb.mxu0 %v139_v13  ;;  %268 = vmatpush.msra.mxu3 %v68_v29 }
  0x3b   :  { %319 = vmatpush.msrb.mxu2 %v134_v15  ;;  %298 = vmatpush.msrb.mxu1 %v140_v16 }
  0x3c   :  { %279 = vmatpush.msrb.mxu0 %v132_v17  ;;  %269 = vmatmul.f32.vlgmr.msra.gmra.mxu3 %v514_v10 }
  0x3d   :  { %320 = vmatpush.msrb.mxu2 %v127_v19  ;;  %299 = vmatpush.msrb.mxu1 %v133_v20 }
  0x3e   :  { %280 = vmatpush.msrb.mxu0 %v125_v21 }
  0x3f   :  { %321 = vmatpush.msrb.mxu2 %v120_v23  ;;  %300 = vmatpush.msrb.mxu1 %v126_v24 }
  0x40   :  { %281 = vmatpush.msrb.mxu0 %v118_v25 }
  0x41   :  { %322 = vmatpush.msrb.mxu2 %v113_v26  ;;  %301 = vmatpush.msrb.mxu1 %v119_v27 }
  0x42   :  { %282 = vmatpush.msrb.mxu0 %v111_v28 }
  0x43   :  { %323 = vmatpush.msrb.mxu2 %v106_v30  ;;  %302 = vmatpush.msrb.mxu1 %v112_v31 }
  0x44   :  { %283 = vmatpush.msrb.mxu0 %v104_v32 }
  0x45   :  { %324 = vmatpush.msrb.mxu2 %v99_v33  ;;  %303 = vmatpush.msrb.mxu1 %v105_v34 }
  0x46   :  { %284 = vmatpush.msrb.mxu0 %v97_v35 }
  0x47   :  { %325 = vmatpush.msrb.mxu2 %v92_v36  ;;  %304 = vmatpush.msrb.mxu1 %v98_v37 }
  0x48   :  { %209 = vmatmul.f32.vlgmr.msra.gmra.mxu0 %v514_v10 }
  0x49   :  { %326 = vmatpush.msrb.mxu2 %v85_v38  ;;  %285 = vmatpush.msrb.mxu0 %v90_v39 }
  0x4a   :  { %305 = vmatpush.msrb.mxu1 %v91_v40 }
  0x4b   :  { %327 = vmatpush.msrb.mxu2 %v78_v41  ;;  %286 = vmatpush.msrb.mxu0 %v83_v42 }
  0x4c   :  { %306 = vmatpush.msrb.mxu1 %v84_v43 }
  0x4d   :  { %328 = vmatpush.msrb.mxu2 %v71_v44  ;;  %287 = vmatpush.msrb.mxu0 %v76_v45 }
  0x4e   :  { %329 = vmatmul.f32.vlgmr.msrb.gmra.mxu2 %v514_v10  ;;  %307 = vmatpush.msrb.mxu1 %v77_v46 }
  0x4f   :  { %288 = vmatpush.msrb.mxu0 %v69_v47 }
  0x50   :  { %308 = vmatpush.msrb.mxu1 %v70_v48  ;;  %289 = vmatmul.f32.vlgmr.msrb.gmra.mxu0 %v514_v10 }
  0x51   :  { %309 = vmatmul.f32.vlgmr.msrb.gmra.mxu1 %v514_v10 }
  0xb4   :  { %v230_v54 = vpop.f32.mrf.mxu1 }
  0xb5   :  { %v231_v55 = vadd.f32 %v230_v54, %v180_v51 }
  0xb7   :  { %335 = vst [vmem:[#allocation9 + $0x8] sm:$0xff] %v231_v55 }
  0xbb   :  { %v250_v52 = vpop.f32.mrf.mxu2 }
  0xbc   :  { %v251_v53 = vadd.f32 %v250_v52, %v181_v50 }
  0xbe   :  { %337 = vst [vmem:[#allocation9 + $0x10] sm:$0xff] %v251_v53 }
  0xbf   :  { %v270_v60 = vpop.f32.mrf.mxu3 }
  0xc0   :  { %v271_v61 = vadd.f32 %v270_v60, %v182_v57 }
  0xc2   :  { %339 = vst [vmem:[#allocation9 + $0x18] sm:$0xff] %v271_v61 }
  0xc5   :  { %v210_v58 = vpop.f32.mrf.mxu0 }
  0xc6   :  { %v211_v59 = vadd.f32 %v210_v58, %v179_v56 }
  0xc8   :  { %333 = vst [vmem:[#allocation9] sm:$0xff] %v211_v59 }
  0xcd   :  { %v290_v0 = vpop.f32.mrf.mxu0 }
  0xce   :  { %v291_v1 = vadd.f32 %v290_v0, %v183_v62  ;;  %v310_v2 = vpop.f32.mrf.mxu1 }
  0xcf   :  { %v311_v4 = vadd.f32 %v310_v2, %v184_v63 }
  0xd0   :  { %341 = vst [vmem:[#allocation9 + $0x20] sm:$0xff] %v291_v1 }
  0xd1   :  { %343 = vst [vmem:[#allocation9 + $0x28] sm:$0xff] %v311_v4  ;;  %v330_v5 = vpop.f32.mrf.mxu2 }
  0xd2   :  { %v331_v6 = vadd.f32 %v330_v5, %v185_v3 }
  0xd4   :  { %345 = vst [vmem:[#allocation9 + $0x30] sm:$0xff] %v331_v6 }
  0xd5   :  { %359 = dma.vmem_to_hbm [thread:$0]  %s352_s2, 896, %s354_s30, [#allocation5], %s483_s4, %s483_s4, %s484_s5  }
  0xd6   :  { %475 = dma.done.wait [#allocation5], 896  }
  0xd7   :  { %476 = vsyncadd [#allocation5], 4294966400 }
  0xd8   :  { %364 = vsyncpa [#allocation4], 1 }
  0xd9   :  { %365 = vsyncpa [#allocation7], 1 }
  0xda   :  { %366 = vsyncpa [#allocation5], 1 }

</bundles_post_ra>
